<compile_context>
chip_gen: v7x
topology: tpu7x:2x2x1
jax: 0.10.0
libtpu: 0.0.40
codegen_flags: <defaults>
</compile_context>

<pallas_src>
import jax
import jax.numpy as jnp
from jax.experimental import pallas as pl
from jax.experimental.pallas import tpu as pltpu

OUT_PAD = 128    # lane-dense output width (true out_dim = 10, sliced in wrapper)
MIN_STEPS = 4    # target minimum grid steps for megacore sharding + pipelining


def _round_up(x, m):
    return ((x + m - 1) // m) * m


def classifier_kernel(x_ref, w1_ref, b1_ref, w2_ref, b2_ref, o_ref):
    # hidden = relu(x @ w1 + b1) — full f32 matmul, f32 accumulate.
    h = jnp.dot(x_ref[...], w1_ref[...], preferred_element_type=jnp.float32)
    h = jnp.maximum(h + b1_ref[...], 0.0)          # b1 is (1, 64), broadcasts

    # out = hidden @ w2 + b2  (w2/b2 pre-padded to 128 lanes in the wrapper);
    # store in the (bf16) output dtype -> lane-dense unmasked vst, half traffic.
    o = jnp.dot(h, w2_ref[...], preferred_element_type=jnp.float32)
    o_ref[...] = (o + b2_ref[...]).astype(o_ref.dtype)


def classifier_forward(x, w1, b1, w2, b2, *, max_tile=4096):
    B, d_in = x.shape
    hidden = w1.shape[1]
    out_dim = w2.shape[1]

    # Pad second layer to a lane-dense (multiple-of-128) output width.
    w2p = jnp.zeros((hidden, OUT_PAD), w2.dtype).at[:, :out_dim].set(w2)
    b2p = jnp.zeros((1, OUT_PAD), b2.dtype).at[:, :out_dim].set(b2)

    # --- batch tiling ------------------------------------------------------
    # Pad B to a multiple of 8 (sublane), then pick tb so that
    #   * tb <= max_tile,
    #   * the grid has >= MIN_STEPS steps when the batch allows it,
    #   * tb divides the padded batch (pad waste bounded by < 8*n_steps rows).
    b_pad8 = _round_up(B, 8)
    tb_cap = max(8, min(max_tile, _round_up(pl.cdiv(b_pad8, MIN_STEPS), 8)))
    n_steps = pl.cdiv(b_pad8, tb_cap)
    tb = _round_up(pl.cdiv(b_pad8, n_steps), 8)
    b_pad = n_steps * tb
    if b_pad != B:
        x = jnp.pad(x, ((0, b_pad - B), (0, 0)))

    # Advisory cost hint for XLA scheduling (counts padded work).
    flops = 2 * b_pad * d_in * hidden + 2 * b_pad * hidden * OUT_PAD
    bytes_accessed = (
        b_pad * d_in * x.dtype.itemsize           # x read (f32)
        + b_pad * OUT_PAD * 2                     # out write (bf16)
        + w1.size * w1.dtype.itemsize
        + b1.size * b1.dtype.itemsize
        + w2p.size * w2p.dtype.itemsize
        + b2p.size * b2p.dtype.itemsize
    )

    out_padded = pl.pallas_call(
        classifier_kernel,
        out_shape=jax.ShapeDtypeStruct((b_pad, OUT_PAD), jnp.bfloat16),
        grid_spec=pl.GridSpec(
            grid=(n_steps,),
            in_specs=[
                pl.BlockSpec((tb, d_in), lambda i: (i, 0)),        # x tile
                pl.BlockSpec((d_in, hidden), lambda i: (0, 0)),    # w1 (resident)
                pl.BlockSpec((1, hidden), lambda i: (0, 0)),       # b1 (resident)
                pl.BlockSpec((hidden, OUT_PAD), lambda i: (0, 0)), # w2 (resident)
                pl.BlockSpec((1, OUT_PAD), lambda i: (0, 0)),      # b2 (resident)
            ],
            out_specs=pl.BlockSpec((tb, OUT_PAD), lambda i: (i, 0)),
        ),
        compiler_params=pltpu.CompilerParams(
            dimension_semantics=("parallel",),
        ),
        cost_estimate=pl.CostEstimate(
            flops=flops, transcendentals=0, bytes_accessed=bytes_accessed),
    )(x, w1, b1, w2p, b2p)

    # Fold slice + bf16->f32 cast into one op; fuses under jit.
    return out_padded[:B, :out_dim].astype(jnp.float32)


def init_params(key):
    # Deterministic synthetic init, matching nn.Linear shapes:
    #   linear1.weight (64,128) -> stored transposed as (128,64); bias (64,)
    #   linear2.weight (10,64)  -> stored transposed as (64,10);  bias (10,)
    k1, k2, k3, k4 = jax.random.split(key, 4)
    w1 = jax.random.normal(k1, (128, 64), jnp.float32) * 0.05
    b1 = jax.random.normal(k2, (1, 64), jnp.float32) * 0.05
    w2 = jax.random.normal(k3, (64, 10), jnp.float32) * 0.05
    b2 = jax.random.normal(k4, (1, 10), jnp.float32) * 0.05
    return w1, b1, w2, b2


def _reference(x, w1, b1, w2, b2):
    return jnp.maximum(x @ w1 + b1, 0.0) @ w2 + b2


if __name__ == "__main__":
    key = jax.random.PRNGKey(0)
    kx, kx2, kp = jax.random.split(key, 3)
    w1, b1, w2, b2 = init_params(kp)

    fwd = jax.jit(classifier_forward)

    # Small single-tile case (B=8 -> one grid step).
    B = 8
    x = jax.random.normal(kx, (B, 128), jnp.float32)
    out = fwd(x, w1, b1, w2, b2)
    jax.block_until_ready(out)
    ref = _reference(x, w1, b1, w2, b2)
    assert out.shape == (B, 10)
    # f32 matmuls, bf16 only at the output write -> tight-ish tolerance.
    assert jnp.allclose(out, ref, atol=1e-2, rtol=1e-2)

    # Multi-step grid + batch-padding path (B not a multiple of 8 or the tile).
    B2 = 52
    x2 = jax.random.normal(kx2, (B2, 128), jnp.float32)
    out2 = fwd(x2, w1, b1, w2, b2)
    jax.block_until_ready(out2)
    ref2 = _reference(x2, w1, b1, w2, b2)
    assert out2.shape == (B2, 10)
    assert jnp.allclose(out2, ref2, atol=1e-2, rtol=1e-2)

    print("KERNEL_OK")
</pallas_src>

<mosaic_0001>
module attributes {stable_mosaic.version = 11 : i64} {
  func.func @classifier_kernel(%arg0: i32, %arg1: memref<8x128xf32, #tpu.memory_space<vmem>>, %arg2: memref<128x64xf32, #tpu.memory_space<vmem>>, %arg3: memref<1x64xf32, #tpu.memory_space<vmem>>, %arg4: memref<64x128xf32, #tpu.memory_space<vmem>>, %arg5: memref<1x128xf32, #tpu.memory_space<vmem>>, %arg6: memref<8x128xbf16, #tpu.memory_space<vmem>>) attributes {dimension_semantics = [#tpu.dimension_semantics<parallel>], iteration_bounds = array<i64: 1>, scalar_prefetch = 0 : i64, scratch_operands = 0 : i64, tpu.core_type = #tpu.core_type<tc>, window_params = [{transform_indices = @transform_0, window_bounds = array<i64: 8, 128>}, {pipeline_mode = #tpu.pipeline_mode<synchronous>, transform_indices = @transform_1, window_bounds = array<i64: 128, 64>}, {pipeline_mode = #tpu.pipeline_mode<synchronous>, transform_indices = @transform_2, window_bounds = array<i64: 1, 64>}, {pipeline_mode = #tpu.pipeline_mode<synchronous>, transform_indices = @transform_3, window_bounds = array<i64: 64, 128>}, {pipeline_mode = #tpu.pipeline_mode<synchronous>, transform_indices = @transform_4, window_bounds = array<i64: 1, 128>}, {transform_indices = @transform_5, window_bounds = array<i64: 8, 128>}]} {
    %c0 = arith.constant 0 : index
    %c0_0 = arith.constant 0 : index
    %0 = vector.load %arg1[%c0, %c0_0] : memref<8x128xf32, #tpu.memory_space<vmem>>, vector<8x128xf32>
    %c0_1 = arith.constant 0 : index
    %c0_2 = arith.constant 0 : index
    %1 = vector.load %arg2[%c0_1, %c0_2] : memref<128x64xf32, #tpu.memory_space<vmem>>, vector<128x64xf32>
    %cst = arith.constant dense<0.000000e+00> : vector<8x64xf32>
    %2 = tpu.matmul %0, %1, %cst {dimension_numbers = #tpu.dot_dimension_numbers<[1], [0], [0], [1], [0, 0, 1, 1], [], []>} : vector<8x128xf32>, vector<128x64xf32>, vector<8x64xf32> -> vector<8x64xf32>
    %c0_3 = arith.constant 0 : index
    %c0_4 = arith.constant 0 : index
    %3 = vector.load %arg3[%c0_3, %c0_4] : memref<1x64xf32, #tpu.memory_space<vmem>>, vector<1x64xf32>
    %4 = vector.broadcast %3 : vector<1x64xf32> to vector<8x64xf32>
    %5 = arith.addf %2, %4 : vector<8x64xf32>
    %cst_5 = arith.constant 0.000000e+00 : f32
    %6 = vector.broadcast %cst_5 : f32 to vector<8x64xf32>
    %7 = arith.maximumf %5, %6 : vector<8x64xf32>
    %c0_6 = arith.constant 0 : index
    %c0_7 = arith.constant 0 : index
    %8 = vector.load %arg4[%c0_6, %c0_7] : memref<64x128xf32, #tpu.memory_space<vmem>>, vector<64x128xf32>
    %cst_8 = arith.constant dense<0.000000e+00> : vector<8x128xf32>
    %9 = tpu.matmul %7, %8, %cst_8 {dimension_numbers = #tpu.dot_dimension_numbers<[1], [0], [0], [1], [0, 0, 1, 1], [], []>} : vector<8x64xf32>, vector<64x128xf32>, vector<8x128xf32> -> vector<8x128xf32>
    %c0_9 = arith.constant 0 : index
    %c0_10 = arith.constant 0 : index
    %10 = vector.load %arg5[%c0_9, %c0_10] : memref<1x128xf32, #tpu.memory_space<vmem>>, vector<1x128xf32>
    %11 = vector.broadcast %10 : vector<1x128xf32> to vector<8x128xf32>
    %12 = arith.addf %9, %11 : vector<8x128xf32>
    %13 = arith.truncf %12 : vector<8x128xf32> to vector<8x128xbf16>
    %c0_11 = arith.constant 0 : index
    %c0_12 = arith.constant 0 : index
    %14 = vector.load %arg6[%c0_11, %c0_12] : memref<8x128xbf16, #tpu.memory_space<vmem>>, vector<8x128xbf16>
    tpu.vector_store %arg6[%c0_11, %c0_12], %13 {strides = array<i32>} : memref<8x128xbf16, #tpu.memory_space<vmem>>, vector<8x128xbf16>,
    return
  }
  func.func @transform_0(%arg0: i32) -> (i32, i32) {
    %c0_i32 = arith.constant 0 : i32
    %c0_i32_0 = arith.constant 0 : i32
    return %arg0, %c0_i32 : i32, i32
  }
  func.func @transform_1(%arg0: i32) -> (i32, i32) {
    %c0_i32 = arith.constant 0 : i32
    %c0_i32_0 = arith.constant 0 : i32
    %c0_i32_1 = arith.constant 0 : i32
    return %c0_i32, %c0_i32_0 : i32, i32
  }
  func.func @transform_2(%arg0: i32) -> (i32, i32) {
    %c0_i32 = arith.constant 0 : i32
    %c0_i32_0 = arith.constant 0 : i32
    %c0_i32_1 = arith.constant 0 : i32
    return %c0_i32, %c0_i32_0 : i32, i32
  }
  func.func @transform_3(%arg0: i32) -> (i32, i32) {
    %c0_i32 = arith.constant 0 : i32
    %c0_i32_0 = arith.constant 0 : i32
    %c0_i32_1 = arith.constant 0 : i32
    return %c0_i32, %c0_i32_0 : i32, i32
  }
  func.func @transform_4(%arg0: i32) -> (i32, i32) {
    %c0_i32 = arith.constant 0 : i32
    %c0_i32_0 = arith.constant 0 : i32
    %c0_i32_1 = arith.constant 0 : i32
    return %c0_i32, %c0_i32_0 : i32, i32
  }
  func.func @transform_5(%arg0: i32) -> (i32, i32) {
    %c0_i32 = arith.constant 0 : i32
    %c0_i32_0 = arith.constant 0 : i32
    return %arg0, %c0_i32 : i32, i32
  }
}

</mosaic_0001>

<bundles_post_ra>
// kernel: classifier_forward.1
= control target key start
LH: loop header
LB: loop body
LE: loop exit
PB: predicated region body
PF: predicated region fallthrough
CT: control target
= control target key end

     0   :  { %v332_v0 = vmov 0.0|0.0   ;;  %vm333_vm0 = vmmov 0   ;;  %v334_v4 = vmov 0.0   ;;  %vm130_vm1 = vcmask 523264   ;;  %s449_s1 = inlined_call_operand.vmem [shape: f32[128,64], index: 1, kind: input, shape index: {}]   ;;  %s450_s3 = inlined_call_operand.vmem [shape: f32[64,128], index: 3, kind: input, shape index: {}]   ;;  %s451_s0 = inlined_call_operand.vmem [shape: f32[8,128], index: 0, kind: input, shape index: {}]   ;;  %s452_s2 = inlined_call_operand.vmem [shape: f32[1,64], index: 2, kind: input, shape index: {}]   ;;  %s453_s4 = inlined_call_operand.vmem [shape: f32[1,128], index: 4, kind: input, shape index: {}]   ;;  %s454_s5 = inlined_call_operand.vmem [shape: bf16[8,128], index: 5, kind: output, shape index: {}]  }
   0x1   :  { %293 = vmatprep.subr.bf16.mxu0 %v332_v0  ;;  %v21_v1 = vld [vmem:[%s449_s1] sm:$0xff]  ;;  %v22_v2 = vld [vmem:[%s449_s1 + $0x8] sm:$0xff]  ;;  %v23_v3 = vld [vmem:[%s449_s1 + $0x10] sm:$0xff]  ;;  %271 = vmatprep.mubr.msk.f32.mxu0 %vm333_vm0, %v334_v4 }
   0x2   :  { %v294_v5 = vpack.c.bf16 %v22_v2, %v21_v1  ;;  %v24_v6 = vld [vmem:[%s449_s1 + $0x18] sm:$0xff]  ;;  %317 = vmatprep.subr.bf16.mxu1 %v332_v0  ;;  %290 = vmatprep.mubr.msk.f32.mxu1 %vm333_vm0, %v334_v4  ;;  %v25_v8 = vld [vmem:[%s449_s1 + $0x20] sm:$0xff]  ;;  %v26_v9 = vld [vmem:[%s449_s1 + $0x28] sm:$0xff] }
   0x3   :  { %v297_v7 = vpack.c.bf16 %v24_v6, %v23_v3  ;;  %v115_v10 = vld [vmem:[%s450_s3] sm:$0xff]  ;;  %v116_v11 = vld [vmem:[%s450_s3 + $0x8] sm:$0xff]  ;;  %v117_v12 = vld [vmem:[%s450_s3 + $0x10] sm:$0xff]  ;;  %v300_v14 = vpack.c.bf16 %v26_v9, %v25_v8 }
   0x4   :  { %295 = vmatpush3.bf16.msra.mxu0 %v294_v5  ;;  %v118_v13 = vld [vmem:[%s450_s3 + $0x18] sm:$0xff]  ;;  %v318_v15 = vpack.c.bf16 %v116_v11, %v115_v10  ;;  %v27_v16 = vld [vmem:[%s449_s1 + $0x30] sm:$0xff]  ;;  %v119_v19 = vld [vmem:[%s450_s3 + $0x20] sm:$0xff] }
   0x5   :  { %296 = vmatprep.subr.bf16.mxu0 %v332_v0  ;;  %v28_v17 = vld [vmem:[%s449_s1 + $0x38] sm:$0xff]  ;;  %v321_v18 = vpack.c.bf16 %v118_v13, %v117_v12  ;;  %v120_v20 = vld [vmem:[%s450_s3 + $0x28] sm:$0xff]  ;;  %v29_v22 = vld [vmem:[%s449_s1 + $0x40] sm:$0xff] }
   0x6   :  { %319 = vmatpush3.bf16.msra.mxu1 %v318_v15  ;;  %v303_v21 = vpack.c.bf16 %v28_v17, %v27_v16  ;;  %v30_v23 = vld [vmem:[%s449_s1 + $0x48] sm:$0xff]  ;;  %v324_v24 = vpack.c.bf16 %v120_v20, %v119_v19  ;;  %v31_v26 = vld [vmem:[%s449_s1 + $0x50] sm:$0xff]  ;;  %v32_v27 = vld [vmem:[%s449_s1 + $0x58] sm:$0xff] }
   0x7   :  { %320 = vmatprep.subr.bf16.mxu1 %v332_v0  ;;  %v306_v25 = vpack.c.bf16 %v30_v23, %v29_v22  ;;  %v309_v28 = vpack.c.bf16 %v32_v27, %v31_v26  ;;  %v33_v29 = vld [vmem:[%s449_s1 + $0x60] sm:$0xff]  ;;  %v34_v30 = vld [vmem:[%s449_s1 + $0x68] sm:$0xff]  ;;  %v35_v32 = vld [vmem:[%s449_s1 + $0x70] sm:$0xff] }
   0x8   :  { %298 = vmatpush3.bf16.msra.mxu0 %v297_v7  ;;  %v312_v31 = vpack.c.bf16 %v34_v30, %v33_v29  ;;  %v36_v33 = vld [vmem:[%s449_s1 + $0x78] sm:$0xff]  ;;  %v20_v35 = vld [vmem:[%s451_s0] sm:$0xff]  ;;  %v121_v36 = vld [vmem:[%s450_s3 + $0x30] sm:$0xff] }
   0x9   :  { %299 = vmatprep.subr.bf16.mxu0 %v332_v0  ;;  %v315_v34 = vpack.c.bf16 %v36_v33, %v35_v32  ;;  %v122_v37 = vld [vmem:[%s450_s3 + $0x38] sm:$0xff]  ;;  %v210_v39 = vld [vmem:[%s452_s2] ss:$0 sm:$0xff] }
   0xa   :  { %322 = vmatpush3.bf16.msra.mxu1 %v321_v18  ;;  %v327_v38 = vpack.c.bf16 %v122_v37, %v121_v36  ;;  %v211_v44 = vld [vmem:[%s453_s4] ss:$0 sm:$0xff] }
   0xb   :  { %323 = vmatprep.subr.bf16.mxu1 %v332_v0 }
   0xc   :  { %301 = vmatpush3.bf16.msra.mxu0 %v300_v14 }
   0xd   :  { %302 = vmatprep.subr.bf16.mxu0 %v332_v0 }
   0xe   :  { %325 = vmatpush3.bf16.msra.mxu1 %v324_v24 }
   0xf   :  { %326 = vmatprep.subr.bf16.mxu1 %v332_v0 }
  0x10   :  { %304 = vmatpush3.bf16.msra.mxu0 %v303_v21 }
  0x11   :  { %305 = vmatprep.subr.bf16.mxu0 %v332_v0 }
  0x12   :  { %328 = vmatpush3.bf16.msra.mxu1 %v327_v38 }
  0x14   :  { %307 = vmatpush3.bf16.msra.mxu0 %v306_v25 }
  0x15   :  { %308 = vmatprep.subr.bf16.mxu0 %v332_v0 }
  0x18   :  { %310 = vmatpush3.bf16.msra.mxu0 %v309_v28 }
  0x19   :  { %311 = vmatprep.subr.bf16.mxu0 %v332_v0 }
  0x1c   :  { %313 = vmatpush3.bf16.msra.mxu0 %v312_v31 }
  0x1d   :  { %314 = vmatprep.subr.bf16.mxu0 %v332_v0 }
  0x20   :  { %316 = vmatpush3.bf16.msra.mxu0 %v315_v34 }
  0x23   :  { %272 = vmatmul.mubr.f32.vlgmr.msra.gmra.mrb[0].mxu0 %v20_v35 }
  0xf6   :  { %v110_v40 = vpop.f32.mrb[0].mxu0 }
  0xf7   :  { %v111_v41 = vadd.f32 %v210_v39, %v110_v40  ;;  %v273_v42 = vpop.f32.mrb[1].mxu0 }
  0xf9   :  { %v114_v43 = vmax.f32 %v111_v41, 0.0 }
  0xfb   :  { %291 = vmatmul.mubr.msk.f32.vlgmr.msra.gmra.mrb[0].mxu1 %vm130_vm1, %v114_v43 }
 0x1ce   :  { %v200_v45 = vpop.f32.mrb[0].mxu1 }
 0x1cf   :  { %v201_v46 = vadd.f32 %v211_v44, %v200_v45  ;;  %v292_v47 = vpop.f32.mrb[1].mxu1 }
 0x1d1   :  { %v204_v48 = vpack.c.bf16 %v201_v46, %v201_v46 }
 0x1d3   :  { %205 = vst [vmem:[%s454_s5] sm:$0xf] %v204_v48 }

</bundles_post_ra>
